<compile_context>
chip_gen: v5e
topology: v5e:2x2
jax: 0.10.0
libtpu: 0.0.40
codegen_flags: <defaults>
</compile_context>

<pallas_src>
import jax
import jax.numpy as jnp
from jax.experimental import pallas as pl
from jax.experimental.pallas import tpu as pltpu

IN_FEATURES = 4
OUT_FEATURES = 3
STACK_COPIES = 4  # torch.stack((x, x, x, x), dim=1)


def _model_kernel(w_ref, b_ref, x_ref, o_ref):
    # w_ref: (IN,)  f32 in SMEM  -- 2 * column-sum of the Linear weight
    # b_ref: (1,)   f32 in SMEM  -- 2 * sum of the Linear bias
    # x_ref: (TB, IN) in VMEM
    # o_ref: (TB, STACK_COPIES) in VMEM
    x = x_ref[...].astype(jnp.float32)

    # Unrolled per-column multiply-add on the VPU (no MXU, no XLU reduce).
    s = x[:, 0:1] * w_ref[0]
    for k in range(1, IN_FEATURES):
        s = s + x[:, k : k + 1] * w_ref[k]
    s = s + b_ref[0]  # (TB, 1)

    # All 4 stacked copies produce the same row value -> broadcast store.
    # TODO(synk): for very large B, a lane-dense (…,128) output slab would
    # avoid masked partial stores; irrelevant at these shapes.
    o_ref[...] = jnp.broadcast_to(s, o_ref.shape).astype(o_ref.dtype)


def model_forward(x, w, b):
    B = x.shape[0]

    # Precompute the collapsed parameters outside the kernel (tiny, one-time).
    w_eff = 2.0 * jnp.sum(w.astype(jnp.float32), axis=0)          # (IN,)
    b_eff = (2.0 * jnp.sum(b.astype(jnp.float32))).reshape(1)     # (1,)

    # Batch tiling: whole array for small B, 512-row tiles (pipelined,
    # megacore-parallel) when B is large and divisible.
    if B >= 1024 and B % 512 == 0:
        tb = 512
    else:
        tb = B
    grid = (B // tb,)

    return pl.pallas_call(
        _model_kernel,
        out_shape=jax.ShapeDtypeStruct((B, STACK_COPIES), x.dtype),
        grid_spec=pltpu.PrefetchScalarGridSpec(
            num_scalar_prefetch=0,
            grid=grid,
            in_specs=[
                # Reduced weights + scalar bias live in SMEM (no VMEM tile DMA).
                pl.BlockSpec(memory_space=pltpu.MemorySpace.SMEM),
                pl.BlockSpec(memory_space=pltpu.MemorySpace.SMEM),
                # Batch-tiled activation block.
                pl.BlockSpec((tb, IN_FEATURES), lambda i: (i, 0)),
            ],
            out_specs=pl.BlockSpec((tb, STACK_COPIES), lambda i: (i, 0)),
        ),
        compiler_params=pltpu.CompilerParams(
            dimension_semantics=("parallel",),
        ),
    )(w_eff, b_eff, x)


def reference_forward(x, w, b):
    # Pure-JAX reference mirroring the PyTorch module step by step.
    y = x @ w.T + b                                     # (B, 3)
    s = jnp.stack((y, y, y, y), axis=1)                 # (B, 4, 3)
    c = jnp.concatenate((s, s), axis=2)                 # (B, 4, 6)
    return jnp.sum(c, axis=2).reshape(x.shape[0], -1)   # (B, 4)


if __name__ == "__main__":
    key = jax.random.PRNGKey(0)
    kx, kw, kb = jax.random.split(key, 3)

    B = 2
    x = jax.random.normal(kx, (B, IN_FEATURES), dtype=jnp.float32)
    # Deterministic "nn.Linear(4, 3)" parameters (synthetic init).
    w = jax.random.normal(kw, (OUT_FEATURES, IN_FEATURES), dtype=jnp.float32) * 0.5
    b = jax.random.normal(kb, (OUT_FEATURES,), dtype=jnp.float32) * 0.1

    out = model_forward(x, w, b)
    out = jax.block_until_ready(out)

    ref = reference_forward(x, w, b)
    assert out.shape == (B, STACK_COPIES), out.shape
    assert jnp.allclose(out, ref, atol=1e-5, rtol=1e-5), (out, ref)

    print("KERNEL_OK")
</pallas_src>

<mosaic_0001>
module attributes {stable_mosaic.version = 11 : i64} {
  func.func @_model_kernel(%arg0: i32, %arg1: memref<4xf32, #tpu.memory_space<smem>>, %arg2: memref<1xf32, #tpu.memory_space<smem>>, %arg3: memref<2x4xf32, #tpu.memory_space<vmem>>, %arg4: memref<2x4xf32, #tpu.memory_space<vmem>>) attributes {dimension_semantics = [#tpu.dimension_semantics<parallel>], iteration_bounds = array<i64: 1>, scalar_prefetch = 0 : i64, scratch_operands = 0 : i64, tpu.core_type = #tpu.core_type<tc>, window_params = [{transform_indices = @transform_0, window_bounds = array<i64: 4>}, {transform_indices = @transform_1, window_bounds = array<i64: 1>}, {transform_indices = @transform_2, window_bounds = array<i64: 2, 4>}, {transform_indices = @transform_3, window_bounds = array<i64: 2, 4>}]} {
    %c0 = arith.constant 0 : index
    %c0_0 = arith.constant 0 : index
    %0 = vector.load %arg3[%c0, %c0_0] : memref<2x4xf32, #tpu.memory_space<vmem>>, vector<2x4xf32>
    %1 = vector.extract_strided_slice %0 {offsets = [0, 0], sizes = [2, 1], strides = [1, 1]} : vector<2x4xf32> to vector<2x1xf32>
    %c0_1 = arith.constant 0 : index
    %2 = memref.load %arg1[%c0_1] : memref<4xf32, #tpu.memory_space<smem>>
    %3 = vector.broadcast %2 : f32 to vector<2x1xf32>
    %4 = arith.mulf %1, %3 : vector<2x1xf32>
    %5 = vector.extract_strided_slice %0 {offsets = [0, 1], sizes = [2, 1], strides = [1, 1]} : vector<2x4xf32> to vector<2x1xf32>
    %c1 = arith.constant 1 : index
    %6 = memref.load %arg1[%c1] : memref<4xf32, #tpu.memory_space<smem>>
    %7 = vector.broadcast %6 : f32 to vector<2x1xf32>
    %8 = arith.mulf %5, %7 : vector<2x1xf32>
    %9 = arith.addf %4, %8 : vector<2x1xf32>
    %10 = vector.extract_strided_slice %0 {offsets = [0, 2], sizes = [2, 1], strides = [1, 1]} : vector<2x4xf32> to vector<2x1xf32>
    %c2 = arith.constant 2 : index
    %11 = memref.load %arg1[%c2] : memref<4xf32, #tpu.memory_space<smem>>
    %12 = vector.broadcast %11 : f32 to vector<2x1xf32>
    %13 = arith.mulf %10, %12 : vector<2x1xf32>
    %14 = arith.addf %9, %13 : vector<2x1xf32>
    %15 = vector.extract_strided_slice %0 {offsets = [0, 3], sizes = [2, 1], strides = [1, 1]} : vector<2x4xf32> to vector<2x1xf32>
    %c3 = arith.constant 3 : index
    %16 = memref.load %arg1[%c3] : memref<4xf32, #tpu.memory_space<smem>>
    %17 = vector.broadcast %16 : f32 to vector<2x1xf32>
    %18 = arith.mulf %15, %17 : vector<2x1xf32>
    %19 = arith.addf %14, %18 : vector<2x1xf32>
    %c0_2 = arith.constant 0 : index
    %20 = memref.load %arg2[%c0_2] : memref<1xf32, #tpu.memory_space<smem>>
    %21 = vector.broadcast %20 : f32 to vector<2x1xf32>
    %22 = arith.addf %19, %21 : vector<2x1xf32>
    %23 = vector.shape_cast %22 : vector<2x1xf32> to vector<2x1xf32>
    %24 = vector.broadcast %23 : vector<2x1xf32> to vector<2x4xf32>
    %c0_3 = arith.constant 0 : index
    %c0_4 = arith.constant 0 : index
    %25 = vector.load %arg4[%c0_3, %c0_4] : memref<2x4xf32, #tpu.memory_space<vmem>>, vector<2x4xf32>
    tpu.vector_store %arg4[%c0_3, %c0_4], %24 {strides = array<i32>} : memref<2x4xf32, #tpu.memory_space<vmem>>, vector<2x4xf32>,
    return
  }
  func.func @transform_0(%arg0: i32) -> i32 {
    %c0_i32 = arith.constant 0 : i32
    %c0_i32_0 = arith.constant 0 : i32
    return %c0_i32 : i32
  }
  func.func @transform_1(%arg0: i32) -> i32 {
    %c0_i32 = arith.constant 0 : i32
    %c0_i32_0 = arith.constant 0 : i32
    return %c0_i32 : i32
  }
  func.func @transform_2(%arg0: i32) -> (i32, i32) {
    %c0_i32 = arith.constant 0 : i32
    %c0_i32_0 = arith.constant 0 : i32
    return %arg0, %c0_i32 : i32, i32
  }
  func.func @transform_3(%arg0: i32) -> (i32, i32) {
    %c0_i32 = arith.constant 0 : i32
    %c0_i32_0 = arith.constant 0 : i32
    return %arg0, %c0_i32 : i32, i32
  }
}

</mosaic_0001>

<bundles_post_ra>
// kernel: tpu_custom_call.1
= control target key start
LH: loop header
LB: loop body
LE: loop exit
PB: predicated region body
PF: predicated region fallthrough
CT: control target
= control target key end

     0   :  { %9 = vsyncpa [#allocation5], 0  ;;  %s173_s0 = inlined_call_operand.hbm [shape: f32[4], index: 0, kind: input, shape index: {}]   ;;  %s174_s1 = inlined_call_operand.<no memory space> [shape: f32[1], index: 1, kind: input, shape index: {}]   ;;  %s175_s2 = inlined_call_operand.vmem [shape: f32[2,4], index: 2, kind: input, shape index: {}]   ;;  %s176_s3 = inlined_call_operand.hbm [shape: f32[2,4], index: 3, kind: output, shape index: {}]  }
   0x1   :  { %10 = vsyncpa [#allocation4], 0  ;;  %s16_s14 = sshll.u32 %s173_s0, 4  ;;  %s135_s15 = smov [#allocation3]   ;;  %s17_s14 = int_to_ptr.hbm [resolvable:$true] %s16_s14 }
   0x2   :  { %19 = dma.hbm_to_smem %s17_s14, 16, %s135_s15, [#allocation5]  }
   0x3   :  { %131 = dma.done.wait [#allocation5], 16  }
   0x4   :  { %132 = vsyncadd [#allocation5], 4294967280 }
   0x5   :  { %28 = sfence }
   0x6   :  { %s84_s16 = sld [smem:[#allocation3 + $0x1]]  ;;  %v29_v0 = vld [vmem:[%s175_s2] sm:$0x3]  ;;  %s136_s21 = smov 127   ;;  %v139_v7 = vmov 0   ;;  %v58_v15 = vstv %s174_s1  ;;  %vm65_vm0 = vcmask 25600  }
   0x7   :  { %s85_s17 = sld [smem:[#allocation3 + $0x2]]  ;;  %s137_s0 = smov 125   ;;  %93 = vset.pattern.permute.xlu1 %v139_v7  ;;  %94 = vset.pattern.permute.xlu0 %v139_v7 }
   0x8   :  { %s86_s18 = sld [smem:[#allocation3 + $0x3]]  ;;  %s138_s22 = smov 126  }
   0x9   :  { %s30_s23 = sld [smem:[#allocation3]]  ;;  %s140_s25 = smov [#allocation6]  }
   0xa   :  { %s72_s26 = sshll.u32 %s140_s25, 4  ;;  %s74_s29 = sshll.u32 %s176_s3, 4  ;;  %s73_s26 = int_to_ptr.vmem [resolvable:$true] %s72_s26  ;;  %s75_s29 = int_to_ptr.hbm [resolvable:$true] %s74_s29 }
   0xc   :  { %v34_v1 = vstv %s84_s16 }
   0xd   :  { %v35_v2 = vmul.f32 %v34_v1, %v29_v0  ;;  %v42_v5 = vstv %s85_s17 }
   0xe   :  { %v50_v3 = vstv %s86_s18  ;;  %v43_v6 = vmul.f32 %v42_v5, %v29_v0 }
   0xf   :  { %37 = vrot.lane.b32.xlu0 %v35_v2, %s136_s21  ;;  %v51_v4 = vmul.f32 %v50_v3, %v29_v0  ;;  %v31_v8 = vstv %s30_s23 }
  0x10   :  { %v32_v10 = vmul.f32 %v31_v8, %v29_v0 }
  0x11   :  { %53 = vrot.lane.b32.xlu1 %v51_v4, %s137_s0 }
  0x17   :  { %45 = vrot.lane.b32.xlu0 %v43_v6, %s138_s22 }
  0x81   :  { %v38_v9 = vpop.permute.xlu0 %37 }
  0x82   :  { %v40_v11 = vadd.f32 %v38_v9, %v32_v10 }
  0x83   :  { %v54_v13 = vpop.permute.xlu1 %53 }
  0x89   :  { %v46_v12 = vpop.permute.xlu0 %45 }
  0x8a   :  { %v48_v14 = vadd.f32 %v46_v12, %v40_v11 }
  0x8c   :  { %v56_v16 = vadd.f32 %v54_v13, %v48_v14 }
  0x8e   :  { %v59_v17 = vadd.f32 %v58_v15, %v56_v16 }
  0x90   :  { %62 = vperm.xlu1 %93, %v59_v17  }
 0x102   :  { %v63_v18 = vpop.permute.xlu1 %62 }
 0x103   :  { %66 = vst.msk [vmem:[#allocation6] sm:$0x3] %vm65_vm0, %v63_v18 }
 0x104   :  { %77 = dma.vmem_to_hbm [thread:$0]  %s73_s26, 32, %s75_s29, [#allocation4]  }
 0x105   :  { %133 = dma.done.wait [#allocation4], 32  }
 0x106   :  { %134 = vsyncadd [#allocation4], 4294967264 }
 0x107   :  { %82 = vsyncpa [#allocation4], 1 }
 0x108   :  { %83 = vsyncpa [#allocation5], 1 }

</bundles_post_ra>
